<compile_context>
chip_gen: v5e
topology: v5e:2x2
jax: 0.10.0
libtpu: 0.0.40
codegen_flags: <defaults>
</compile_context>

<pallas_src>
import functools

import jax
import jax.numpy as jnp
from jax.experimental import pallas as pl
from jax.experimental.pallas import tpu as pltpu


# ----------------------------------------------------------------------------
# helpers
# ----------------------------------------------------------------------------
def _round_up(x, m):
    return ((x + m - 1) // m) * m


# Nature-DQN conv stack: (kernel, stride, out_channels)
_CONV_ARCH = ((8, 4, 32), (4, 2, 64), (3, 1, 64))
_HIDDEN = 512


# ----------------------------------------------------------------------------
# Pallas kernel 1: tiled  out = [relu](x @ w + b)   (bf16 in, f32 accumulate)
# ----------------------------------------------------------------------------
def _gemm_bias_act_kernel(x_ref, w_ref, b_ref, o_ref, acc_ref, *, apply_relu):
    k = pl.program_id(2)

    @pl.when(k == 0)
    def _init():
        acc_ref[...] = jnp.zeros_like(acc_ref)

    acc_ref[...] += jnp.dot(x_ref[...], w_ref[...],
                            preferred_element_type=jnp.float32)

    @pl.when(k == pl.num_programs(2) - 1)
    def _finalize():
        out = acc_ref[...] + b_ref[...]          # bias is f32, broadcasts over rows
        if apply_relu:
            out = jnp.maximum(out, 0.0)
        o_ref[...] = out.astype(o_ref.dtype)


def pallas_gemm_bias(x, w, b, *, relu, out_dtype=jnp.bfloat16,
                     bm=256, bn=256, bk=1024):
    """x: (M, K) bf16, w: (Kp, N) bf16 (Kp >= K, multiples of 128),
    b: (1, N) f32  ->  (M, N) out_dtype."""
    M, K = x.shape
    Kp, N = w.shape
    assert Kp >= K and Kp % 128 == 0 and N % 128 == 0 and b.shape == (1, N)

    # adapt tiles to the problem, keep (8, 128) layout alignment
    bm = min(bm, _round_up(M, 8))
    bn = min(bn, N)
    if N % bn:
        bn = 128
    bk = min(bk, Kp)
    Mp = _round_up(M, bm)
    Kp2 = _round_up(Kp, bk)

    x = x.astype(jnp.bfloat16)
    if (Mp, Kp2) != (M, K):
        x = jnp.pad(x, ((0, Mp - M), (0, Kp2 - K)))
    if Kp2 != Kp:                                    # rare fallback path
        w = jnp.pad(w, ((0, Kp2 - Kp), (0, 0)))

    grid = (Mp // bm, N // bn, Kp2 // bk)
    out = pl.pallas_call(
        functools.partial(_gemm_bias_act_kernel, apply_relu=relu),
        out_shape=jax.ShapeDtypeStruct((Mp, N), out_dtype),
        grid=grid,
        in_specs=[
            pl.BlockSpec((bm, bk), lambda i, j, k: (i, k)),
            pl.BlockSpec((bk, bn), lambda i, j, k: (k, j)),
            pl.BlockSpec((1, bn), lambda i, j, k: (0, j)),
        ],
        out_specs=pl.BlockSpec((bm, bn), lambda i, j, k: (i, j)),
        scratch_shapes=[pltpu.VMEM((bm, bn), jnp.float32)],
        compiler_params=pltpu.CompilerParams(
            dimension_semantics=("parallel", "parallel", "arbitrary")),
    )(x, w, b)
    return out[:M] if Mp != M else out


# ----------------------------------------------------------------------------
# Pallas kernel 2: fused MLP head  q = (relu(x @ w1 + b1)) @ w2 + b2
# (512-wide hidden activation never leaves VMEM)
# ----------------------------------------------------------------------------
def _mlp_head_kernel(x_ref, w1_ref, b1_ref, w2_ref, b2_ref, o_ref):
    h = jnp.dot(x_ref[...], w1_ref[...], preferred_element_type=jnp.float32)
    h = jnp.maximum(h + b1_ref[...], 0.0)
    q = jnp.dot(h.astype(jnp.bfloat16), w2_ref[...],
                preferred_element_type=jnp.float32)
    o_ref[...] = q + b2_ref[...]


def pallas_mlp_head(x, w1, b1, w2, b2, *, bm=256):
    """x: (M, K) bf16, w1: (K, H) bf16, w2: (H, Np) bf16 -> (M, Np) f32."""
    M, K = x.shape
    H = w1.shape[1]
    Np = w2.shape[1]

    bm = min(bm, _round_up(M, 8))
    Mp = _round_up(M, bm)
    x = x.astype(jnp.bfloat16)
    if Mp != M:
        x = jnp.pad(x, ((0, Mp - M), (0, 0)))

    out = pl.pallas_call(
        _mlp_head_kernel,
        out_shape=jax.ShapeDtypeStruct((Mp, Np), jnp.float32),
        grid=(Mp // bm,),
        in_specs=[
            pl.BlockSpec((bm, K), lambda i: (i, 0)),
            pl.BlockSpec((K, H), lambda i: (0, 0)),
            pl.BlockSpec((1, H), lambda i: (0, 0)),
            pl.BlockSpec((H, Np), lambda i: (0, 0)),
            pl.BlockSpec((1, Np), lambda i: (0, 0)),
        ],
        out_specs=pl.BlockSpec((bm, Np), lambda i: (i, 0)),
        compiler_params=pltpu.CompilerParams(
            dimension_semantics=("parallel",)),
    )(x, w1, b1, w2, b2)
    return out[:M] if Mp != M else out


# ----------------------------------------------------------------------------
# im2col glue (NHWC, strided slices + concat — no gathers, no transposes)
# ----------------------------------------------------------------------------
def im2col_nhwc(x, k, s, c):
    """x: (N, H, W, C_maybe_padded) -> patches (N*OH*OW, k*k*c), OH, OW.

    Only the first `c` (real) channels are kept, so lane-padding from the
    previous Pallas GEMM is dropped for free.  Feature ordering is (kh, kw, c),
    matching the packed weight layout.
    """
    N, H, W, _ = x.shape
    OH = (H - k) // s + 1
    OW = (W - k) // s + 1
    xc = x[..., :c]
    cols = []
    for kh in range(k):
        for kw in range(k):
            cols.append(jax.lax.slice(
                xc,
                (0, kh, kw, 0),
                (N, kh + (OH - 1) * s + 1, kw + (OW - 1) * s + 1, c),
                (1, s, s, 1)))                      # (N, OH, OW, c)
    patches = jnp.concatenate(cols, axis=-1)        # (N, OH, OW, k*k*c)
    return patches.reshape(N * OH * OW, k * k * c), OH, OW


# ----------------------------------------------------------------------------
# parameter packing (done once, outside the per-forward path)
# ----------------------------------------------------------------------------
def prepare_params(params, conv3_spatial):
    """Convert PyTorch-layout params into kernel-ready packed params.

    Conv weights (O,C,k,k) -> (K_pad, O_pad) bf16 (K padded to 128-multiple,
    lane-padded out channels), fc1 weight permuted from NCHW-flatten to
    NHWC-flatten ordering, fc2 weight padded to 128 output lanes.  Biases
    become (1, N) f32 rows.
    """
    (w1, b1), (w2, b2), (w3, b3), (wf1, bf1), (wf2, bf2) = params

    def pack_conv(w, b):
        O, C, k, _ = w.shape
        K = k * k * C
        Kp = _round_up(K, 128)
        Op = _round_up(O, 128)
        wm = jnp.transpose(w, (2, 3, 1, 0)).reshape(K, O)
        wm = jnp.pad(wm, ((0, Kp - K), (0, Op - O))).astype(jnp.bfloat16)
        bm = jnp.pad(b.reshape(1, O), ((0, 0), (0, Op - O))).astype(jnp.float32)
        return wm, bm

    convs = tuple(pack_conv(w, b) for w, b in ((w1, b1), (w2, b2), (w3, b3)))

    oh, ow = conv3_spatial
    c3 = _CONV_ARCH[-1][2]
    # fc1: (512, C*OH*OW) NCHW-flatten -> (OH*OW*C, 512) NHWC-flatten
    wf1p = (wf1.reshape(_HIDDEN, c3, oh, ow)
                .transpose(0, 2, 3, 1)
                .reshape(_HIDDEN, -1).T).astype(jnp.bfloat16)
    bf1p = bf1.reshape(1, _HIDDEN).astype(jnp.float32)

    A = wf2.shape[0]
    Ap = _round_up(A, 128)
    wf2p = jnp.pad(wf2.T, ((0, 0), (0, Ap - A))).astype(jnp.bfloat16)
    bf2p = jnp.pad(bf2.reshape(1, A), ((0, 0), (0, Ap - A))).astype(jnp.float32)

    return (convs, wf1p, bf1p, wf2p, bf2p)


# ----------------------------------------------------------------------------
# QLearner forward
# ----------------------------------------------------------------------------
def qlearner_forward(x, packed, *, num_actions):
    convs, wf1, bf1, wf2, bf2 = packed
    n = x.shape[0]

    # NCHW -> NHWC once, bf16 activations from here on.
    x = jnp.transpose(x, (0, 2, 3, 1)).astype(jnp.bfloat16)

    c_in = x.shape[-1]
    for (w_mat, b_row), (k, s, c_out) in zip(convs, _CONV_ARCH):
        patches, oh, ow = im2col_nhwc(x, k, s, c_in)
        y = pallas_gemm_bias(patches, w_mat, b_row, relu=True,
                             out_dtype=jnp.bfloat16)
        x = y.reshape(n, oh, ow, y.shape[-1])       # channels lane-padded to 128
        c_in = c_out

    x = x[..., :c_in]                               # drop lane padding (conv3)
    feat = x.reshape(n, -1)                         # NHWC flatten (fc1 pre-permuted)

    q = pallas_mlp_head(feat, wf1, bf1, wf2, bf2)   # fused fc1(+relu)+fc2, f32
    return q[:, :num_actions]


# ----------------------------------------------------------------------------
# reference (pure JAX/XLA, f32) and param init in PyTorch layout
# ----------------------------------------------------------------------------
def reference_forward(x, params):
    (w1, b1), (w2, b2), (w3, b3), (wf1, bf1), (wf2, bf2) = params

    def conv(x, w, b, s):
        y = jax.lax.conv_general_dilated(
            x, w, (s, s), "VALID",
            dimension_numbers=("NCHW", "OIHW", "NCHW"))
        return jax.nn.relu(y + b[None, :, None, None])

    x = conv(x, w1, b1, 4)
    x = conv(x, w2, b2, 2)
    x = conv(x, w3, b3, 1)
    x = x.reshape(x.shape[0], -1)
    x = jax.nn.relu(x @ wf1.T + bf1)
    return x @ wf2.T + bf2


def init_params(key, in_channels, feature_size, num_actions):
    ks = jax.random.split(key, 10)

    def w(k, shape, fan_in):
        return (jax.random.normal(k, shape, jnp.float32) / jnp.sqrt(fan_in))

    return (
        (w(ks[0], (32, in_channels, 8, 8), in_channels * 64),
         0.01 * jax.random.normal(ks[1], (32,), jnp.float32)),
        (w(ks[2], (64, 32, 4, 4), 32 * 16),
         0.01 * jax.random.normal(ks[3], (64,), jnp.float32)),
        (w(ks[4], (64, 64, 3, 3), 64 * 9),
         0.01 * jax.random.normal(ks[5], (64,), jnp.float32)),
        (w(ks[6], (512, feature_size), feature_size),
         0.01 * jax.random.normal(ks[7], (512,), jnp.float32)),
        (w(ks[8], (num_actions, 512), 512),
         0.01 * jax.random.normal(ks[9], (num_actions,), jnp.float32)),
    )


if __name__ == "__main__":
    # Small but valid shapes: 36 -> 8 -> 3 -> 1 spatial through the conv stack.
    batch = 2
    in_channels = 4
    spatial = 36
    num_actions = 6

    def conv_out(h, k, s):
        return (h - k) // s + 1

    s1 = conv_out(spatial, 8, 4)
    s2 = conv_out(s1, 4, 2)
    s3 = conv_out(s2, 3, 1)
    feature_size = 64 * s3 * s3

    key = jax.random.PRNGKey(0)
    k_x, k_p = jax.random.split(key)
    x = jax.random.normal(k_x, (batch, in_channels, spatial, spatial), jnp.float32)

    params = init_params(k_p, in_channels, feature_size, num_actions)
    packed = prepare_params(params, conv3_spatial=(s3, s3))

    fwd = jax.jit(functools.partial(qlearner_forward, num_actions=num_actions))
    q_vals = jax.block_until_ready(fwd(x, packed))

    assert q_vals.shape == (batch, num_actions)
    assert bool(jnp.all(jnp.isfinite(q_vals)))

    # Loose correctness check vs f32 reference (kernel uses bf16 operands with
    # f32 accumulation, so allow a few-percent normalized error).
    q_ref = reference_forward(x, params)
    err = float(jnp.max(jnp.abs(q_vals - q_ref)) /
                (jnp.max(jnp.abs(q_ref)) + 1e-6))
    assert err < 0.1, f"mismatch vs reference: {err}"

    print("KERNEL_OK")
</pallas_src>

<mosaic_0001>
module attributes {stable_mosaic.version = 11 : i64} {
  func.func @_gemm_bias_act_kernel(%arg0: i32, %arg1: i32, %arg2: i32, %arg3: memref<128x256xbf16, #tpu.memory_space<vmem>>, %arg4: memref<256x128xbf16, #tpu.memory_space<vmem>>, %arg5: memref<1x128xf32, #tpu.memory_space<vmem>>, %arg6: memref<128x128xbf16, #tpu.memory_space<vmem>>, %arg7: memref<128x128xf32, #tpu.memory_space<vmem>>) attributes {dimension_semantics = [#tpu.dimension_semantics<parallel>, #tpu.dimension_semantics<parallel>, #tpu.dimension_semantics<arbitrary>], iteration_bounds = array<i64: 1, 1, 1>, scalar_prefetch = 0 : i64, scratch_operands = 1 : i64, tpu.core_type = #tpu.core_type<tc>, window_params = [{transform_indices = @transform_0, window_bounds = array<i64: 128, 256>}, {transform_indices = @transform_1, window_bounds = array<i64: 256, 128>}, {transform_indices = @transform_2, window_bounds = array<i64: 1, 128>}, {transform_indices = @transform_3, window_bounds = array<i64: 128, 128>}]} {
    %c0_i32 = arith.constant 0 : i32
    %0 = arith.cmpi eq, %arg2, %c0_i32 : i32
    %1 = arith.extui %0 : i1 to i32
    %c0_i32_0 = arith.constant 0 : i32
    %2 = arith.cmpi ne, %1, %c0_i32_0 : i32
    scf.if %2 {
      %cst_10 = arith.constant 0.000000e+00 : f32
      %12 = vector.broadcast %cst_10 : f32 to vector<128x128xf32>
      %c0_11 = arith.constant 0 : index
      %c0_12 = arith.constant 0 : index
      %13 = vector.load %arg7[%c0_11, %c0_12] : memref<128x128xf32, #tpu.memory_space<vmem>>, vector<128x128xf32>
      tpu.vector_store %arg7[%c0_11, %c0_12], %12 {strides = array<i32>} : memref<128x128xf32, #tpu.memory_space<vmem>>, vector<128x128xf32>,
    } else {
    }
    %c0 = arith.constant 0 : index
    %c0_1 = arith.constant 0 : index
    %3 = vector.load %arg7[%c0, %c0_1] : memref<128x128xf32, #tpu.memory_space<vmem>>, vector<128x128xf32>
    %c0_2 = arith.constant 0 : index
    %c0_3 = arith.constant 0 : index
    %4 = vector.load %arg3[%c0_2, %c0_3] : memref<128x256xbf16, #tpu.memory_space<vmem>>, vector<128x256xbf16>
    %c0_4 = arith.constant 0 : index
    %c0_5 = arith.constant 0 : index
    %5 = vector.load %arg4[%c0_4, %c0_5] : memref<256x128xbf16, #tpu.memory_space<vmem>>, vector<256x128xbf16>
    %cst = arith.constant dense<0.000000e+00> : vector<128x128xf32>
    %6 = tpu.matmul %4, %5, %cst {dimension_numbers = #tpu.dot_dimension_numbers<[1], [0], [0], [1], [0, 0, 1, 1], [], []>} : vector<128x256xbf16>, vector<256x128xbf16>, vector<128x128xf32> -> vector<128x128xf32>
    %7 = arith.addf %3, %6 : vector<128x128xf32>
    %c0_6 = arith.constant 0 : index
    %c0_7 = arith.constant 0 : index
    %8 = vector.load %arg7[%c0_6, %c0_7] : memref<128x128xf32, #tpu.memory_space<vmem>>, vector<128x128xf32>
    tpu.vector_store %arg7[%c0_6, %c0_7], %7 {strides = array<i32>} : memref<128x128xf32, #tpu.memory_space<vmem>>, vector<128x128xf32>,
    %c0_i32_8 = arith.constant 0 : i32
    %9 = arith.cmpi eq, %arg2, %c0_i32_8 : i32
    %10 = arith.extui %9 : i1 to i32
    %c0_i32_9 = arith.constant 0 : i32
    %11 = arith.cmpi ne, %10, %c0_i32_9 : i32
    scf.if %11 {
      %c0_10 = arith.constant 0 : index
      %c0_11 = arith.constant 0 : index
      %12 = vector.load %arg7[%c0_10, %c0_11] : memref<128x128xf32, #tpu.memory_space<vmem>>, vector<128x128xf32>
      %c0_12 = arith.constant 0 : index
      %c0_13 = arith.constant 0 : index
      %13 = vector.load %arg5[%c0_12, %c0_13] : memref<1x128xf32, #tpu.memory_space<vmem>>, vector<1x128xf32>
      %14 = vector.broadcast %13 : vector<1x128xf32> to vector<128x128xf32>
      %15 = arith.addf %12, %14 : vector<128x128xf32>
      %cst_14 = arith.constant 0.000000e+00 : f32
      %16 = vector.broadcast %cst_14 : f32 to vector<128x128xf32>
      %17 = arith.maximumf %15, %16 : vector<128x128xf32>
      %18 = arith.truncf %17 : vector<128x128xf32> to vector<128x128xbf16>
      %c0_15 = arith.constant 0 : index
      %c0_16 = arith.constant 0 : index
      %19 = vector.load %arg6[%c0_15, %c0_16] : memref<128x128xbf16, #tpu.memory_space<vmem>>, vector<128x128xbf16>
      tpu.vector_store %arg6[%c0_15, %c0_16], %18 {strides = array<i32>} : memref<128x128xbf16, #tpu.memory_space<vmem>>, vector<128x128xbf16>,
    } else {
    }
    return
  }
  func.func @transform_0(%arg0: i32, %arg1: i32, %arg2: i32) -> (i32, i32) {
    %c0_i32 = arith.constant 0 : i32
    return %arg0, %arg2 : i32, i32
  }
  func.func @transform_1(%arg0: i32, %arg1: i32, %arg2: i32) -> (i32, i32) {
    %c0_i32 = arith.constant 0 : i32
    return %arg2, %arg1 : i32, i32
  }
  func.func @transform_2(%arg0: i32, %arg1: i32, %arg2: i32) -> (i32, i32) {
    %c0_i32 = arith.constant 0 : i32
    %c0_i32_0 = arith.constant 0 : i32
    return %c0_i32, %arg1 : i32, i32
  }
  func.func @transform_3(%arg0: i32, %arg1: i32, %arg2: i32) -> (i32, i32) {
    %c0_i32 = arith.constant 0 : i32
    return %arg0, %arg1 : i32, i32
  }
}

module attributes {stable_mosaic.version = 11 : i64} {
  func.func @_gemm_bias_act_kernel(%arg0: i32, %arg1: i32, %arg2: i32, %arg3: memref<24x512xbf16, #tpu.memory_space<vmem>>, %arg4: memref<512x128xbf16, #tpu.memory_space<vmem>>, %arg5: memref<1x128xf32, #tpu.memory_space<vmem>>, %arg6: memref<24x128xbf16, #tpu.memory_space<vmem>>, %arg7: memref<24x128xf32, #tpu.memory_space<vmem>>) attributes {dimension_semantics = [#tpu.dimension_semantics<parallel>, #tpu.dimension_semantics<parallel>, #tpu.dimension_semantics<arbitrary>], iteration_bounds = array<i64: 1, 1, 1>, scalar_prefetch = 0 : i64, scratch_operands = 1 : i64, tpu.core_type = #tpu.core_type<tc>, window_params = [{transform_indices = @transform_0, window_bounds = array<i64: 24, 512>}, {transform_indices = @transform_1, window_bounds = array<i64: 512, 128>}, {transform_indices = @transform_2, window_bounds = array<i64: 1, 128>}, {transform_indices = @transform_3, window_bounds = array<i64: 24, 128>}]} {
    %c0_i32 = arith.constant 0 : i32
    %0 = arith.cmpi eq, %arg2, %c0_i32 : i32
    %1 = arith.extui %0 : i1 to i32
    %c0_i32_0 = arith.constant 0 : i32
    %2 = arith.cmpi ne, %1, %c0_i32_0 : i32
    scf.if %2 {
      %cst_10 = arith.constant 0.000000e+00 : f32
      %12 = vector.broadcast %cst_10 : f32 to vector<24x128xf32>
      %c0_11 = arith.constant 0 : index
      %c0_12 = arith.constant 0 : index
      %13 = vector.load %arg7[%c0_11, %c0_12] : memref<24x128xf32, #tpu.memory_space<vmem>>, vector<24x128xf32>
      tpu.vector_store %arg7[%c0_11, %c0_12], %12 {strides = array<i32>} : memref<24x128xf32, #tpu.memory_space<vmem>>, vector<24x128xf32>,
    } else {
    }
    %c0 = arith.constant 0 : index
    %c0_1 = arith.constant 0 : index
    %3 = vector.load %arg7[%c0, %c0_1] : memref<24x128xf32, #tpu.memory_space<vmem>>, vector<24x128xf32>
    %c0_2 = arith.constant 0 : index
    %c0_3 = arith.constant 0 : index
    %4 = vector.load %arg3[%c0_2, %c0_3] : memref<24x512xbf16, #tpu.memory_space<vmem>>, vector<24x512xbf16>
    %c0_4 = arith.constant 0 : index
    %c0_5 = arith.constant 0 : index
    %5 = vector.load %arg4[%c0_4, %c0_5] : memref<512x128xbf16, #tpu.memory_space<vmem>>, vector<512x128xbf16>
    %cst = arith.constant dense<0.000000e+00> : vector<24x128xf32>
    %6 = tpu.matmul %4, %5, %cst {dimension_numbers = #tpu.dot_dimension_numbers<[1], [0], [0], [1], [0, 0, 1, 1], [], []>} : vector<24x512xbf16>, vector<512x128xbf16>, vector<24x128xf32> -> vector<24x128xf32>
    %7 = arith.addf %3, %6 : vector<24x128xf32>
    %c0_6 = arith.constant 0 : index
    %c0_7 = arith.constant 0 : index
    %8 = vector.load %arg7[%c0_6, %c0_7] : memref<24x128xf32, #tpu.memory_space<vmem>>, vector<24x128xf32>
    tpu.vector_store %arg7[%c0_6, %c0_7], %7 {strides = array<i32>} : memref<24x128xf32, #tpu.memory_space<vmem>>, vector<24x128xf32>,
    %c0_i32_8 = arith.constant 0 : i32
    %9 = arith.cmpi eq, %arg2, %c0_i32_8 : i32
    %10 = arith.extui %9 : i1 to i32
    %c0_i32_9 = arith.constant 0 : i32
    %11 = arith.cmpi ne, %10, %c0_i32_9 : i32
    scf.if %11 {
      %c0_10 = arith.constant 0 : index
      %c0_11 = arith.constant 0 : index
      %12 = vector.load %arg7[%c0_10, %c0_11] : memref<24x128xf32, #tpu.memory_space<vmem>>, vector<24x128xf32>
      %c0_12 = arith.constant 0 : index
      %c0_13 = arith.constant 0 : index
      %13 = vector.load %arg5[%c0_12, %c0_13] : memref<1x128xf32, #tpu.memory_space<vmem>>, vector<1x128xf32>
      %14 = vector.broadcast %13 : vector<1x128xf32> to vector<24x128xf32>
      %15 = arith.addf %12, %14 : vector<24x128xf32>
      %cst_14 = arith.constant 0.000000e+00 : f32
      %16 = vector.broadcast %cst_14 : f32 to vector<24x128xf32>
      %17 = arith.maximumf %15, %16 : vector<24x128xf32>
      %18 = arith.truncf %17 : vector<24x128xf32> to vector<24x128xbf16>
      %c0_15 = arith.constant 0 : index
      %c0_16 = arith.constant 0 : index
      %19 = vector.load %arg6[%c0_15, %c0_16] : memref<24x128xbf16, #tpu.memory_space<vmem>>, vector<24x128xbf16>
      tpu.vector_store %arg6[%c0_15, %c0_16], %18 {strides = array<i32>} : memref<24x128xbf16, #tpu.memory_space<vmem>>, vector<24x128xbf16>,
    } else {
    }
    return
  }
  func.func @transform_0(%arg0: i32, %arg1: i32, %arg2: i32) -> (i32, i32) {
    %c0_i32 = arith.constant 0 : i32
    return %arg0, %arg2 : i32, i32
  }
  func.func @transform_1(%arg0: i32, %arg1: i32, %arg2: i32) -> (i32, i32) {
    %c0_i32 = arith.constant 0 : i32
    return %arg2, %arg1 : i32, i32
  }
  func.func @transform_2(%arg0: i32, %arg1: i32, %arg2: i32) -> (i32, i32) {
    %c0_i32 = arith.constant 0 : i32
    %c0_i32_0 = arith.constant 0 : i32
    return %c0_i32, %arg1 : i32, i32
  }
  func.func @transform_3(%arg0: i32, %arg1: i32, %arg2: i32) -> (i32, i32) {
    %c0_i32 = arith.constant 0 : i32
    return %arg0, %arg1 : i32, i32
  }
}

module attributes {stable_mosaic.version = 11 : i64} {
  func.func @_gemm_bias_act_kernel(%arg0: i32, %arg1: i32, %arg2: i32, %arg3: memref<8x640xbf16, #tpu.memory_space<vmem>>, %arg4: memref<640x128xbf16, #tpu.memory_space<vmem>>, %arg5: memref<1x128xf32, #tpu.memory_space<vmem>>, %arg6: memref<8x128xbf16, #tpu.memory_space<vmem>>, %arg7: memref<8x128xf32, #tpu.memory_space<vmem>>) attributes {dimension_semantics = [#tpu.dimension_semantics<parallel>, #tpu.dimension_semantics<parallel>, #tpu.dimension_semantics<arbitrary>], iteration_bounds = array<i64: 1, 1, 1>, scalar_prefetch = 0 : i64, scratch_operands = 1 : i64, tpu.core_type = #tpu.core_type<tc>, window_params = [{transform_indices = @transform_0, window_bounds = array<i64: 8, 640>}, {transform_indices = @transform_1, window_bounds = array<i64: 640, 128>}, {transform_indices = @transform_2, window_bounds = array<i64: 1, 128>}, {transform_indices = @transform_3, window_bounds = array<i64: 8, 128>}]} {
    %c0_i32 = arith.constant 0 : i32
    %0 = arith.cmpi eq, %arg2, %c0_i32 : i32
    %1 = arith.extui %0 : i1 to i32
    %c0_i32_0 = arith.constant 0 : i32
    %2 = arith.cmpi ne, %1, %c0_i32_0 : i32
    scf.if %2 {
      %cst_10 = arith.constant 0.000000e+00 : f32
      %12 = vector.broadcast %cst_10 : f32 to vector<8x128xf32>
      %c0_11 = arith.constant 0 : index
      %c0_12 = arith.constant 0 : index
      %13 = vector.load %arg7[%c0_11, %c0_12] : memref<8x128xf32, #tpu.memory_space<vmem>>, vector<8x128xf32>
      tpu.vector_store %arg7[%c0_11, %c0_12], %12 {strides = array<i32>} : memref<8x128xf32, #tpu.memory_space<vmem>>, vector<8x128xf32>,
    } else {
    }
    %c0 = arith.constant 0 : index
    %c0_1 = arith.constant 0 : index
    %3 = vector.load %arg7[%c0, %c0_1] : memref<8x128xf32, #tpu.memory_space<vmem>>, vector<8x128xf32>
    %c0_2 = arith.constant 0 : index
    %c0_3 = arith.constant 0 : index
    %4 = vector.load %arg3[%c0_2, %c0_3] : memref<8x640xbf16, #tpu.memory_space<vmem>>, vector<8x640xbf16>
    %c0_4 = arith.constant 0 : index
    %c0_5 = arith.constant 0 : index
    %5 = vector.load %arg4[%c0_4, %c0_5] : memref<640x128xbf16, #tpu.memory_space<vmem>>, vector<640x128xbf16>
    %cst = arith.constant dense<0.000000e+00> : vector<8x128xf32>
    %6 = tpu.matmul %4, %5, %cst {dimension_numbers = #tpu.dot_dimension_numbers<[1], [0], [0], [1], [0, 0, 1, 1], [], []>} : vector<8x640xbf16>, vector<640x128xbf16>, vector<8x128xf32> -> vector<8x128xf32>
    %7 = arith.addf %3, %6 : vector<8x128xf32>
    %c0_6 = arith.constant 0 : index
    %c0_7 = arith.constant 0 : index
    %8 = vector.load %arg7[%c0_6, %c0_7] : memref<8x128xf32, #tpu.memory_space<vmem>>, vector<8x128xf32>
    tpu.vector_store %arg7[%c0_6, %c0_7], %7 {strides = array<i32>} : memref<8x128xf32, #tpu.memory_space<vmem>>, vector<8x128xf32>,
    %c0_i32_8 = arith.constant 0 : i32
    %9 = arith.cmpi eq, %arg2, %c0_i32_8 : i32
    %10 = arith.extui %9 : i1 to i32
    %c0_i32_9 = arith.constant 0 : i32
    %11 = arith.cmpi ne, %10, %c0_i32_9 : i32
    scf.if %11 {
      %c0_10 = arith.constant 0 : index
      %c0_11 = arith.constant 0 : index
      %12 = vector.load %arg7[%c0_10, %c0_11] : memref<8x128xf32, #tpu.memory_space<vmem>>, vector<8x128xf32>
      %c0_12 = arith.constant 0 : index
      %c0_13 = arith.constant 0 : index
      %13 = vector.load %arg5[%c0_12, %c0_13] : memref<1x128xf32, #tpu.memory_space<vmem>>, vector<1x128xf32>
      %14 = vector.broadcast %13 : vector<1x128xf32> to vector<8x128xf32>
      %15 = arith.addf %12, %14 : vector<8x128xf32>
      %cst_14 = arith.constant 0.000000e+00 : f32
      %16 = vector.broadcast %cst_14 : f32 to vector<8x128xf32>
      %17 = arith.maximumf %15, %16 : vector<8x128xf32>
      %18 = arith.truncf %17 : vector<8x128xf32> to vector<8x128xbf16>
      %c0_15 = arith.constant 0 : index
      %c0_16 = arith.constant 0 : index
      %19 = vector.load %arg6[%c0_15, %c0_16] : memref<8x128xbf16, #tpu.memory_space<vmem>>, vector<8x128xbf16>
      tpu.vector_store %arg6[%c0_15, %c0_16], %18 {strides = array<i32>} : memref<8x128xbf16, #tpu.memory_space<vmem>>, vector<8x128xbf16>,
    } else {
    }
    return
  }
  func.func @transform_0(%arg0: i32, %arg1: i32, %arg2: i32) -> (i32, i32) {
    %c0_i32 = arith.constant 0 : i32
    return %arg0, %arg2 : i32, i32
  }
  func.func @transform_1(%arg0: i32, %arg1: i32, %arg2: i32) -> (i32, i32) {
    %c0_i32 = arith.constant 0 : i32
    return %arg2, %arg1 : i32, i32
  }
  func.func @transform_2(%arg0: i32, %arg1: i32, %arg2: i32) -> (i32, i32) {
    %c0_i32 = arith.constant 0 : i32
    %c0_i32_0 = arith.constant 0 : i32
    return %c0_i32, %arg1 : i32, i32
  }
  func.func @transform_3(%arg0: i32, %arg1: i32, %arg2: i32) -> (i32, i32) {
    %c0_i32 = arith.constant 0 : i32
    return %arg0, %arg1 : i32, i32
  }
}

module attributes {stable_mosaic.version = 11 : i64} {
  func.func @_mlp_head_kernel(%arg0: i32, %arg1: memref<8x64xbf16, #tpu.memory_space<vmem>>, %arg2: memref<64x512xbf16, #tpu.memory_space<vmem>>, %arg3: memref<1x512xf32, #tpu.memory_space<vmem>>, %arg4: memref<512x128xbf16, #tpu.memory_space<vmem>>, %arg5: memref<1x128xf32, #tpu.memory_space<vmem>>, %arg6: memref<8x128xf32, #tpu.memory_space<vmem>>) attributes {dimension_semantics = [#tpu.dimension_semantics<parallel>], iteration_bounds = array<i64: 1>, scalar_prefetch = 0 : i64, scratch_operands = 0 : i64, tpu.core_type = #tpu.core_type<tc>, window_params = [{transform_indices = @transform_0, window_bounds = array<i64: 8, 64>}, {pipeline_mode = #tpu.pipeline_mode<synchronous>, transform_indices = @transform_1, window_bounds = array<i64: 64, 512>}, {pipeline_mode = #tpu.pipeline_mode<synchronous>, transform_indices = @transform_2, window_bounds = array<i64: 1, 512>}, {pipeline_mode = #tpu.pipeline_mode<synchronous>, transform_indices = @transform_3, window_bounds = array<i64: 512, 128>}, {pipeline_mode = #tpu.pipeline_mode<synchronous>, transform_indices = @transform_4, window_bounds = array<i64: 1, 128>}, {transform_indices = @transform_5, window_bounds = array<i64: 8, 128>}]} {
    %c0 = arith.constant 0 : index
    %c0_0 = arith.constant 0 : index
    %0 = vector.load %arg1[%c0, %c0_0] : memref<8x64xbf16, #tpu.memory_space<vmem>>, vector<8x64xbf16>
    %c0_1 = arith.constant 0 : index
    %c0_2 = arith.constant 0 : index
    %1 = vector.load %arg2[%c0_1, %c0_2] : memref<64x512xbf16, #tpu.memory_space<vmem>>, vector<64x512xbf16>
    %cst = arith.constant dense<0.000000e+00> : vector<8x512xf32>
    %2 = tpu.matmul %0, %1, %cst {dimension_numbers = #tpu.dot_dimension_numbers<[1], [0], [0], [1], [0, 0, 1, 1], [], []>} : vector<8x64xbf16>, vector<64x512xbf16>, vector<8x512xf32> -> vector<8x512xf32>
    %c0_3 = arith.constant 0 : index
    %c0_4 = arith.constant 0 : index
    %3 = vector.load %arg3[%c0_3, %c0_4] : memref<1x512xf32, #tpu.memory_space<vmem>>, vector<1x512xf32>
    %4 = vector.broadcast %3 : vector<1x512xf32> to vector<8x512xf32>
    %5 = arith.addf %2, %4 : vector<8x512xf32>
    %cst_5 = arith.constant 0.000000e+00 : f32
    %6 = vector.broadcast %cst_5 : f32 to vector<8x512xf32>
    %7 = arith.maximumf %5, %6 : vector<8x512xf32>
    %8 = arith.truncf %7 : vector<8x512xf32> to vector<8x512xbf16>
    %c0_6 = arith.constant 0 : index
    %c0_7 = arith.constant 0 : index
    %9 = vector.load %arg4[%c0_6, %c0_7] : memref<512x128xbf16, #tpu.memory_space<vmem>>, vector<512x128xbf16>
    %cst_8 = arith.constant dense<0.000000e+00> : vector<8x128xf32>
    %10 = tpu.matmul %8, %9, %cst_8 {dimension_numbers = #tpu.dot_dimension_numbers<[1], [0], [0], [1], [0, 0, 1, 1], [], []>} : vector<8x512xbf16>, vector<512x128xbf16>, vector<8x128xf32> -> vector<8x128xf32>
    %c0_9 = arith.constant 0 : index
    %c0_10 = arith.constant 0 : index
    %11 = vector.load %arg5[%c0_9, %c0_10] : memref<1x128xf32, #tpu.memory_space<vmem>>, vector<1x128xf32>
    %12 = vector.broadcast %11 : vector<1x128xf32> to vector<8x128xf32>
    %13 = arith.addf %10, %12 : vector<8x128xf32>
    %c0_11 = arith.constant 0 : index
    %c0_12 = arith.constant 0 : index
    %14 = vector.load %arg6[%c0_11, %c0_12] : memref<8x128xf32, #tpu.memory_space<vmem>>, vector<8x128xf32>
    tpu.vector_store %arg6[%c0_11, %c0_12], %13 {strides = array<i32>} : memref<8x128xf32, #tpu.memory_space<vmem>>, vector<8x128xf32>,
    return
  }
  func.func @transform_0(%arg0: i32) -> (i32, i32) {
    %c0_i32 = arith.constant 0 : i32
    %c0_i32_0 = arith.constant 0 : i32
    return %arg0, %c0_i32 : i32, i32
  }
  func.func @transform_1(%arg0: i32) -> (i32, i32) {
    %c0_i32 = arith.constant 0 : i32
    %c0_i32_0 = arith.constant 0 : i32
    %c0_i32_1 = arith.constant 0 : i32
    return %c0_i32, %c0_i32_0 : i32, i32
  }
  func.func @transform_2(%arg0: i32) -> (i32, i32) {
    %c0_i32 = arith.constant 0 : i32
    %c0_i32_0 = arith.constant 0 : i32
    %c0_i32_1 = arith.constant 0 : i32
    return %c0_i32, %c0_i32_0 : i32, i32
  }
  func.func @transform_3(%arg0: i32) -> (i32, i32) {
    %c0_i32 = arith.constant 0 : i32
    %c0_i32_0 = arith.constant 0 : i32
    %c0_i32_1 = arith.constant 0 : i32
    return %c0_i32, %c0_i32_0 : i32, i32
  }
  func.func @transform_4(%arg0: i32) -> (i32, i32) {
    %c0_i32 = arith.constant 0 : i32
    %c0_i32_0 = arith.constant 0 : i32
    %c0_i32_1 = arith.constant 0 : i32
    return %c0_i32, %c0_i32_0 : i32, i32
  }
  func.func @transform_5(%arg0: i32) -> (i32, i32) {
    %c0_i32 = arith.constant 0 : i32
    %c0_i32_0 = arith.constant 0 : i32
    return %arg0, %c0_i32 : i32, i32
  }
}

</mosaic_0001>

<bundles_post_ra>
// kernel: qlearner_forward.4
= control target key start
LH: loop header
LB: loop body
LE: loop exit
PB: predicated region body
PF: predicated region fallthrough
CT: control target
= control target key end

     0   :  { %s928_s1 = inlined_call_operand.vmem [shape: bf16[256,128], index: 1, kind: input, shape index: {}]   ;;  %s929_s0 = inlined_call_operand.vmem [shape: bf16[128,256], index: 0, kind: input, shape index: {}]   ;;  %s930_s2 = inlined_call_operand.vmem [shape: f32[1,128], index: 2, kind: input, shape index: {}]   ;;  %s931_s3 = inlined_call_operand.vmem [shape: bf16[128,128], index: 3, kind: output, shape index: {}]  }
   0x1   :  { %v646_v0 = vld [vmem:[%s928_s1 + $0x38] sm:$0xff]  ;;  %v645_v2 = vld [vmem:[%s928_s1 + $0x30] sm:$0xff]  ;;  %v644_v4 = vld [vmem:[%s928_s1 + $0x28] sm:$0xff] }
   0x2   :  { %v654_v1 = vld [vmem:[%s928_s1 + $0x78] sm:$0xff]  ;;  %274 = vmatpush.bf16.msra.mxu0 %v646_v0  ;;  %702 = vmatpush.bf16.msra.mxu2 %v646_v0  ;;  %v653_v3 = vld [vmem:[%s928_s1 + $0x70] sm:$0xff]  ;;  %v652_v5 = vld [vmem:[%s928_s1 + $0x68] sm:$0xff] }
   0x3   :  { %323 = vmatpush.bf16.msra.mxu1 %v654_v1  ;;  %710 = vmatpush.bf16.msra.mxu3 %v654_v1  ;;  %v643_v6 = vld [vmem:[%s928_s1 + $0x20] sm:$0xff]  ;;  %v642_v8 = vld [vmem:[%s928_s1 + $0x18] sm:$0xff]  ;;  %v641_v10 = vld [vmem:[%s928_s1 + $0x10] sm:$0xff] }
   0x4   :  { %v651_v7 = vld [vmem:[%s928_s1 + $0x60] sm:$0xff]  ;;  %v650_v9 = vld [vmem:[%s928_s1 + $0x58] sm:$0xff]  ;;  %v649_v11 = vld [vmem:[%s928_s1 + $0x50] sm:$0xff] }
   0x5   :  { %v640_v12 = vld [vmem:[%s928_s1 + $0x8] sm:$0xff]  ;;  %v639_v14 = vld [vmem:[%s928_s1] sm:$0xff]  ;;  %v505_v28 = vld [vmem:[%s929_s0 + $0x10] sm:$0xf] }
   0x6   :  { %275 = vmatpush.bf16.msra.mxu0 %v645_v2  ;;  %703 = vmatpush.bf16.msra.mxu2 %v645_v2  ;;  %v648_v13 = vld [vmem:[%s928_s1 + $0x48] sm:$0xff]  ;;  %v647_v15 = vld [vmem:[%s928_s1 + $0x40] sm:$0xff]  ;;  %v626_v29 = vld [vmem:[%s929_s0 + $0x14] sm:$0xf0] }
   0x7   :  { %324 = vmatpush.bf16.msra.mxu1 %v653_v3  ;;  %711 = vmatpush.bf16.msra.mxu3 %v653_v3  ;;  %v497_v16 = vld [vmem:[%s929_s0] sm:$0xf]  ;;  %v624_v17 = vld [vmem:[%s929_s0 + $0x4] sm:$0xf0]  ;;  %v623_v20 = vld [vmem:[%s929_s0 + $0x4] sm:$0xf]  ;;  %v506_v36 = vor.u32 %v626_v29, %v505_v28 }
   0x8   :  { %v529_v18 = vld [vmem:[%s929_s0 + $0x40] sm:$0xf]  ;;  %v632_v19 = vld [vmem:[%s929_s0 + $0x44] sm:$0xf0]  ;;  %v499_v21 = vld [vmem:[%s929_s0 + $0x8] sm:$0xf0]  ;;  %v498_v24 = vor.u32 %v624_v17, %v497_v16 }
   0x9   :  { %v631_v22 = vld [vmem:[%s929_s0 + $0x44] sm:$0xf]  ;;  %v531_v23 = vld [vmem:[%s929_s0 + $0x48] sm:$0xf0]  ;;  %v530_v25 = vor.u32 %v632_v19, %v529_v18  ;;  %v502_v26 = vor.u32 %v623_v20, %v499_v21  ;;  %v537_v30 = vld [vmem:[%s929_s0 + $0x50] sm:$0xf] }
   0xa   :  { %276 = vmatpush.bf16.msra.mxu0 %v644_v4  ;;  %704 = vmatpush.bf16.msra.mxu2 %v644_v4  ;;  %v534_v27 = vor.u32 %v631_v22, %v531_v23  ;;  %v634_v31 = vld [vmem:[%s929_s0 + $0x54] sm:$0xf0]  ;;  %v625_v32 = vld [vmem:[%s929_s0 + $0x14] sm:$0xf]  ;;  %v507_v33 = vld [vmem:[%s929_s0 + $0x18] sm:$0xf0] }
   0xb   :  { %325 = vmatpush.bf16.msra.mxu1 %v652_v5  ;;  %712 = vmatpush.bf16.msra.mxu3 %v652_v5  ;;  %v633_v34 = vld [vmem:[%s929_s0 + $0x54] sm:$0xf]  ;;  %v539_v35 = vld [vmem:[%s929_s0 + $0x58] sm:$0xf0]  ;;  %v538_v37 = vor.u32 %v634_v31, %v537_v30  ;;  %v510_v38 = vor.u32 %v625_v32, %v507_v33  ;;  %v513_v40 = vld [vmem:[%s929_s0 + $0x20] sm:$0xf] }
   0xc   :  { %v542_v39 = vor.u32 %v633_v34, %v539_v35  ;;  %v628_v41 = vld [vmem:[%s929_s0 + $0x24] sm:$0xf0]  ;;  %v545_v42 = vld [vmem:[%s929_s0 + $0x60] sm:$0xf]  ;;  %v627_v44 = vld [vmem:[%s929_s0 + $0x24] sm:$0xf] }
   0xd   :  { %v636_v43 = vld [vmem:[%s929_s0 + $0x64] sm:$0xf0]  ;;  %v515_v45 = vld [vmem:[%s929_s0 + $0x28] sm:$0xf0]  ;;  %v635_v46 = vld [vmem:[%s929_s0 + $0x64] sm:$0xf]  ;;  %v514_v48 = vor.u32 %v628_v41, %v513_v40 }
   0xe   :  { %277 = vmatpush.bf16.msra.mxu0 %v643_v6  ;;  %705 = vmatpush.bf16.msra.mxu2 %v643_v6  ;;  %v547_v47 = vld [vmem:[%s929_s0 + $0x68] sm:$0xf0]  ;;  %v546_v49 = vor.u32 %v636_v43, %v545_v42  ;;  %v518_v50 = vor.u32 %v627_v44, %v515_v45  ;;  %v521_v52 = vld [vmem:[%s929_s0 + $0x30] sm:$0xf]  ;;  %v630_v53 = vld [vmem:[%s929_s0 + $0x34] sm:$0xf0] }
   0xf   :  { %326 = vmatpush.bf16.msra.mxu1 %v651_v7  ;;  %713 = vmatpush.bf16.msra.mxu3 %v651_v7  ;;  %v550_v51 = vor.u32 %v635_v46, %v547_v47  ;;  %v553_v54 = vld [vmem:[%s929_s0 + $0x70] sm:$0xf]  ;;  %v638_v55 = vld [vmem:[%s929_s0 + $0x74] sm:$0xf0]  ;;  %v629_v56 = vld [vmem:[%s929_s0 + $0x34] sm:$0xf]  ;;  %v522_v60 = vor.u32 %v630_v53, %v521_v52 }
  0x10   :  { %v523_v57 = vld [vmem:[%s929_s0 + $0x38] sm:$0xf0]  ;;  %v637_v58 = vld [vmem:[%s929_s0 + $0x74] sm:$0xf]  ;;  %v554_v61 = vor.u32 %v638_v55, %v553_v54  ;;  %v886_v3 = vld [vmem:[%s930_s2] ss:$0 sm:$0xff] }
  0x11   :  { %v555_v59 = vld [vmem:[%s929_s0 + $0x78] sm:$0xf0]  ;;  %v526_v62 = vor.u32 %v629_v56, %v523_v57 }
  0x12   :  { %278 = vmatpush.bf16.msra.mxu0 %v642_v8  ;;  %706 = vmatpush.bf16.msra.mxu2 %v642_v8  ;;  %v558_v63 = vor.u32 %v637_v58, %v555_v59 }
  0x13   :  { %327 = vmatpush.bf16.msra.mxu1 %v650_v9  ;;  %714 = vmatpush.bf16.msra.mxu3 %v650_v9 }
  0x16   :  { %279 = vmatpush.bf16.msra.mxu0 %v641_v10  ;;  %707 = vmatpush.bf16.msra.mxu2 %v641_v10 }
  0x17   :  { %328 = vmatpush.bf16.msra.mxu1 %v649_v11  ;;  %715 = vmatpush.bf16.msra.mxu3 %v649_v11 }
  0x1a   :  { %280 = vmatpush.bf16.msra.mxu0 %v640_v12  ;;  %708 = vmatpush.bf16.msra.mxu2 %v640_v12 }
  0x1b   :  { %329 = vmatpush.bf16.msra.mxu1 %v648_v13  ;;  %716 = vmatpush.bf16.msra.mxu3 %v648_v13 }
  0x1e   :  { %281 = vmatpush.bf16.msra.mxu0 %v639_v14  ;;  %709 = vmatpush.bf16.msra.mxu2 %v639_v14 }
  0x1f   :  { %330 = vmatpush.bf16.msra.mxu1 %v647_v15  ;;  %717 = vmatpush.bf16.msra.mxu3 %v647_v15 }
  0x21   :  { %282 = vmatmul.bf16.vlgmr.msra.gmra.mxu0 %v498_v24  ;;  %302 = vmatmul.bf16.vlgmr.msra.gmra.mxu2 %v530_v25 }
  0x22   :  { %331 = vmatmul.bf16.vlgmr.msra.gmra.mxu1 %v502_v26  ;;  %351 = vmatmul.bf16.vlgmr.msra.gmra.mxu3 %v534_v27 }
  0x31   :  { %287 = vmatmul.bf16.gmra.mxu0 %v506_v36  ;;  %307 = vmatmul.bf16.gmra.mxu2 %v538_v37 }
  0x32   :  { %336 = vmatmul.bf16.gmra.mxu1 %v510_v38  ;;  %356 = vmatmul.bf16.gmra.mxu3 %v542_v39 }
  0x41   :  { %292 = vmatmul.bf16.gmra.mxu0 %v514_v48  ;;  %312 = vmatmul.bf16.gmra.mxu2 %v546_v49 }
  0x42   :  { %341 = vmatmul.bf16.gmra.mxu1 %v518_v50  ;;  %361 = vmatmul.bf16.gmra.mxu3 %v550_v51 }
  0x51   :  { %297 = vmatmul.bf16.gmra.mxu0 %v522_v60  ;;  %317 = vmatmul.bf16.gmra.mxu2 %v554_v61 }
  0x52   :  { %346 = vmatmul.bf16.gmra.mxu1 %v526_v62  ;;  %366 = vmatmul.bf16.gmra.mxu3 %v558_v63 }
  0x9e   :  { %v283_v0 = vpop.f32.mrf.mxu0 }
  0x9f   :  { %v332_v1 = vpop.f32.mrf.mxu1 }
  0xa0   :  { %v333_v2 = vadd.f32 %v332_v1, %v283_v0 }
  0xa2   :  { %v427_v8 = vadd.f32 %v886_v3, %v333_v2 }
  0xa4   :  { %v303_v4 = vpop.f32.mrf.mxu2  ;;  %v443_v12 = vmax.f32 %v427_v8, 0.0 }
  0xa5   :  { %v352_v5 = vpop.f32.mrf.mxu3 }
  0xa6   :  { %v285_v6 = vpop.f32.mrf.mxu0  ;;  %v353_v10 = vadd.f32 %v352_v5, %v303_v4 }
  0xa7   :  { %v334_v7 = vpop.f32.mrf.mxu1 }
  0xa8   :  { %v335_v9 = vadd.f32 %v334_v7, %v285_v6  ;;  %v435_v16 = vadd.f32 %v886_v3, %v353_v10 }
  0xaa   :  { %v428_v11 = vadd.f32 %v886_v3, %v335_v9  ;;  %v451_v22 = vmax.f32 %v435_v16, 0.0 }
  0xac   :  { %v444_v13 = vmax.f32 %v428_v11, 0.0  ;;  %v305_v14 = vpop.f32.mrf.mxu2 }
  0xad   :  { %v354_v15 = vpop.f32.mrf.mxu3 }
  0xae   :  { %v658_v17 = vpack.c.bf16 %v444_v13, %v443_v12  ;;  %v355_v18 = vadd.f32 %v354_v15, %v305_v14  ;;  %v288_v19 = vpop.f32.mrf.mxu0 }
  0xaf   :  { %v337_v20 = vpop.f32.mrf.mxu1 }
  0xb0   :  { %659 = vst [vmem:[%s931_s3] sm:$0xff] %v658_v17   ;;  %v436_v21 = vadd.f32 %v886_v3, %v355_v18  ;;  %v338_v25 = vadd.f32 %v337_v20, %v288_v19 }
  0xb2   :  { %v452_v23 = vmax.f32 %v436_v21, 0.0  ;;  %v429_v30 = vadd.f32 %v886_v3, %v338_v25 }
  0xb4   :  { %v678_v24 = vpack.c.bf16 %v452_v23, %v451_v22  ;;  %v308_v26 = vpop.f32.mrf.mxu2  ;;  %v445_v34 = vmax.f32 %v429_v30, 0.0 }
  0xb5   :  { %v357_v27 = vpop.f32.mrf.mxu3 }
  0xb6   :  { %698 = vst [vmem:[%s931_s3 + $0x20] sm:$0xff] %v678_v24   ;;  %v290_v28 = vpop.f32.mrf.mxu0  ;;  %v358_v32 = vadd.f32 %v357_v27, %v308_v26 }
  0xb7   :  { %v339_v29 = vpop.f32.mrf.mxu1 }
  0xb8   :  { %v340_v31 = vadd.f32 %v339_v29, %v290_v28  ;;  %v437_v38 = vadd.f32 %v886_v3, %v358_v32 }
  0xba   :  { %v430_v33 = vadd.f32 %v886_v3, %v340_v31  ;;  %v453_v44 = vmax.f32 %v437_v38, 0.0 }
  0xbc   :  { %v446_v35 = vmax.f32 %v430_v33, 0.0  ;;  %v310_v36 = vpop.f32.mrf.mxu2 }
  0xbd   :  { %v359_v37 = vpop.f32.mrf.mxu3 }
  0xbe   :  { %v663_v39 = vpack.c.bf16 %v446_v35, %v445_v34  ;;  %v360_v40 = vadd.f32 %v359_v37, %v310_v36  ;;  %v293_v41 = vpop.f32.mrf.mxu0 }
  0xbf   :  { %v342_v42 = vpop.f32.mrf.mxu1 }
  0xc0   :  { %695 = vst [vmem:[%s931_s3 + $0x8] sm:$0xff] %v663_v39   ;;  %v438_v43 = vadd.f32 %v886_v3, %v360_v40  ;;  %v343_v47 = vadd.f32 %v342_v42, %v293_v41 }
  0xc2   :  { %v454_v45 = vmax.f32 %v438_v43, 0.0  ;;  %v431_v52 = vadd.f32 %v886_v3, %v343_v47 }
  0xc4   :  { %v683_v46 = vpack.c.bf16 %v454_v45, %v453_v44  ;;  %v313_v48 = vpop.f32.mrf.mxu2  ;;  %v447_v56 = vmax.f32 %v431_v52, 0.0 }
  0xc5   :  { %v362_v49 = vpop.f32.mrf.mxu3 }
  0xc6   :  { %699 = vst [vmem:[%s931_s3 + $0x28] sm:$0xff] %v683_v46   ;;  %v295_v50 = vpop.f32.mrf.mxu0  ;;  %v363_v54 = vadd.f32 %v362_v49, %v313_v48 }
  0xc7   :  { %v344_v51 = vpop.f32.mrf.mxu1 }
  0xc8   :  { %v345_v53 = vadd.f32 %v344_v51, %v295_v50  ;;  %v439_v60 = vadd.f32 %v886_v3, %v363_v54 }
  0xca   :  { %v432_v55 = vadd.f32 %v886_v3, %v345_v53  ;;  %v455_v2 = vmax.f32 %v439_v60, 0.0 }
  0xcc   :  { %v448_v57 = vmax.f32 %v432_v55, 0.0  ;;  %v315_v58 = vpop.f32.mrf.mxu2 }
  0xcd   :  { %v364_v59 = vpop.f32.mrf.mxu3 }
  0xce   :  { %v668_v61 = vpack.c.bf16 %v448_v57, %v447_v56  ;;  %v365_v62 = vadd.f32 %v364_v59, %v315_v58  ;;  %v298_v63 = vpop.f32.mrf.mxu0 }
  0xcf   :  { %v347_v0 = vpop.f32.mrf.mxu1 }
  0xd0   :  { %696 = vst [vmem:[%s931_s3 + $0x10] sm:$0xff] %v668_v61   ;;  %v440_v1 = vadd.f32 %v886_v3, %v365_v62  ;;  %v348_v6 = vadd.f32 %v347_v0, %v298_v63 }
  0xd2   :  { %v456_v4 = vmax.f32 %v440_v1, 0.0  ;;  %v433_v11 = vadd.f32 %v886_v3, %v348_v6 }
  0xd4   :  { %v688_v5 = vpack.c.bf16 %v456_v4, %v455_v2  ;;  %v318_v7 = vpop.f32.mrf.mxu2  ;;  %v449_v15 = vmax.f32 %v433_v11, 0.0 }
  0xd5   :  { %v367_v8 = vpop.f32.mrf.mxu3 }
  0xd6   :  { %700 = vst [vmem:[%s931_s3 + $0x30] sm:$0xff] %v688_v5   ;;  %v300_v9 = vpop.f32.mrf.mxu0  ;;  %v368_v13 = vadd.f32 %v367_v8, %v318_v7 }
  0xd7   :  { %v349_v10 = vpop.f32.mrf.mxu1 }
  0xd8   :  { %v350_v12 = vadd.f32 %v349_v10, %v300_v9  ;;  %v441_v19 = vadd.f32 %v886_v3, %v368_v13 }
  0xda   :  { %v434_v14 = vadd.f32 %v886_v3, %v350_v12  ;;  %v457_v23 = vmax.f32 %v441_v19, 0.0 }
  0xdc   :  { %v450_v16 = vmax.f32 %v434_v14, 0.0  ;;  %v320_v17 = vpop.f32.mrf.mxu2 }
  0xdd   :  { %v369_v18 = vpop.f32.mrf.mxu3 }
  0xde   :  { %v673_v20 = vpack.c.bf16 %v450_v16, %v449_v15  ;;  %v370_v21 = vadd.f32 %v369_v18, %v320_v17 }
  0xe0   :  { %697 = vst [vmem:[%s931_s3 + $0x18] sm:$0xff] %v673_v20   ;;  %v442_v22 = vadd.f32 %v886_v3, %v370_v21 }
  0xe2   :  { %v458_v24 = vmax.f32 %v442_v22, 0.0 }
  0xe4   :  { %v693_v25 = vpack.c.bf16 %v458_v24, %v457_v23 }
  0xe6   :  { %701 = vst [vmem:[%s931_s3 + $0x38] sm:$0xff] %v693_v25  }

// kernel: qlearner_forward.5
= control target key start
LH: loop header
LB: loop body
LE: loop exit
PB: predicated region body
PF: predicated region fallthrough
CT: control target
= control target key end

     0   :  { %s765_s1 = inlined_call_operand.vmem [shape: bf16[512,128], index: 1, kind: input, shape index: {}]   ;;  %s766_s0 = inlined_call_operand.vmem [shape: bf16[24,512], index: 0, kind: input, shape index: {}]   ;;  %s767_s2 = inlined_call_operand.vmem [shape: f32[1,128], index: 2, kind: input, shape index: {}]   ;;  %s768_s3 = inlined_call_operand.vmem [shape: bf16[24,128], index: 3, kind: output, shape index: {}]  }
   0x1   :  { %v579_v0 = vld [vmem:[%s765_s1 + $0x38] sm:$0xff]  ;;  %v578_v4 = vld [vmem:[%s765_s1 + $0x30] sm:$0xff]  ;;  %v577_v8 = vld [vmem:[%s765_s1 + $0x28] sm:$0xff] }
   0x2   :  { %v587_v1 = vld [vmem:[%s765_s1 + $0x78] sm:$0xff]  ;;  %320 = vmatpush.bf16.msra.mxu0 %v579_v0  ;;  %v586_v5 = vld [vmem:[%s765_s1 + $0x70] sm:$0xff]  ;;  %v585_v9 = vld [vmem:[%s765_s1 + $0x68] sm:$0xff] }
   0x3   :  { %v595_v2 = vld [vmem:[%s765_s1 + $0xb8] sm:$0xff]  ;;  %338 = vmatpush.bf16.msra.mxu1 %v587_v1  ;;  %v594_v6 = vld [vmem:[%s765_s1 + $0xb0] sm:$0xff]  ;;  %v593_v10 = vld [vmem:[%s765_s1 + $0xa8] sm:$0xff] }
   0x4   :  { %v603_v3 = vld [vmem:[%s765_s1 + $0xf8] sm:$0xff]  ;;  %356 = vmatpush.bf16.msra.mxu2 %v595_v2  ;;  %v602_v7 = vld [vmem:[%s765_s1 + $0xf0] sm:$0xff]  ;;  %v601_v11 = vld [vmem:[%s765_s1 + $0xe8] sm:$0xff] }
   0x5   :  { %374 = vmatpush.bf16.msra.mxu3 %v603_v3  ;;  %v576_v12 = vld [vmem:[%s765_s1 + $0x20] sm:$0xff]  ;;  %v575_v16 = vld [vmem:[%s765_s1 + $0x18] sm:$0xff]  ;;  %v574_v20 = vld [vmem:[%s765_s1 + $0x10] sm:$0xff] }
   0x6   :  { %321 = vmatpush.bf16.msra.mxu0 %v578_v4  ;;  %v584_v13 = vld [vmem:[%s765_s1 + $0x60] sm:$0xff]  ;;  %v583_v17 = vld [vmem:[%s765_s1 + $0x58] sm:$0xff]  ;;  %v582_v21 = vld [vmem:[%s765_s1 + $0x50] sm:$0xff] }
   0x7   :  { %339 = vmatpush.bf16.msra.mxu1 %v586_v5  ;;  %v592_v14 = vld [vmem:[%s765_s1 + $0xa0] sm:$0xff]  ;;  %v591_v18 = vld [vmem:[%s765_s1 + $0x98] sm:$0xff]  ;;  %v590_v22 = vld [vmem:[%s765_s1 + $0x90] sm:$0xff] }
   0x8   :  { %357 = vmatpush.bf16.msra.mxu2 %v594_v6  ;;  %v600_v15 = vld [vmem:[%s765_s1 + $0xe0] sm:$0xff]  ;;  %v599_v19 = vld [vmem:[%s765_s1 + $0xd8] sm:$0xff]  ;;  %v598_v23 = vld [vmem:[%s765_s1 + $0xd0] sm:$0xff] }
   0x9   :  { %375 = vmatpush.bf16.msra.mxu3 %v602_v7  ;;  %v573_v24 = vld [vmem:[%s765_s1 + $0x8] sm:$0xff]  ;;  %v572_v28 = vld [vmem:[%s765_s1] sm:$0xff]  ;;  %v570_v33 = vld [vmem:[%s766_s0 + $0xc] sm:$0xf0] }
   0xa   :  { %322 = vmatpush.bf16.msra.mxu0 %v577_v8  ;;  %v581_v25 = vld [vmem:[%s765_s1 + $0x48] sm:$0xff]  ;;  %v580_v29 = vld [vmem:[%s765_s1 + $0x40] sm:$0xff]  ;;  %v428_v35 = vld [vmem:[%s766_s0 + $0x10] sm:$0xf0] }
   0xb   :  { %340 = vmatpush.bf16.msra.mxu1 %v585_v9  ;;  %v589_v26 = vld [vmem:[%s765_s1 + $0x88] sm:$0xff]  ;;  %v588_v30 = vld [vmem:[%s765_s1 + $0x80] sm:$0xff]  ;;  %v571_v37 = vld [vmem:[%s766_s0 + $0x14] sm:$0xf0] }
   0xc   :  { %358 = vmatpush.bf16.msra.mxu2 %v593_v10  ;;  %v597_v27 = vld [vmem:[%s765_s1 + $0xc8] sm:$0xff]  ;;  %v596_v31 = vld [vmem:[%s765_s1 + $0xc0] sm:$0xff]  ;;  %v436_v39 = vld [vmem:[%s766_s0 + $0x18] sm:$0xf0] }
   0xd   :  { %376 = vmatpush.bf16.msra.mxu3 %v601_v11  ;;  %v426_v32 = vld [vmem:[%s766_s0] sm:$0xf]  ;;  %v568_v34 = vld [vmem:[%s766_s0 + $0x4] sm:$0xf]  ;;  %v434_v36 = vld [vmem:[%s766_s0 + $0x8] sm:$0xf] }
   0xe   :  { %323 = vmatpush.bf16.msra.mxu0 %v576_v12  ;;  %v569_v38 = vld [vmem:[%s766_s0 + $0xc] sm:$0xf]  ;;  %v427_v40 = vor.u32 %v570_v33, %v426_v32  ;;  %v431_v41 = vor.u32 %v568_v34, %v428_v35  ;;  %v435_v42 = vor.u32 %v571_v37, %v434_v36  ;;  %v28_v44 = vld [vmem:[%s766_s0 + $0x20] sm:$0xff] }
   0xf   :  { %341 = vmatpush.bf16.msra.mxu1 %v584_v13  ;;  %v439_v43 = vor.u32 %v569_v38, %v436_v39  ;;  %v29_v45 = vld [vmem:[%s766_s0 + $0x28] sm:$0xff]  ;;  %v108_v46 = vunpack.c.l.b16 %v28_v44  ;;  %v109_v47 = vunpack.c.h.b16 %v28_v44  ;;  %v609_v63 = vld [vmem:[%s767_s2] ss:$0 sm:$0xff] }
  0x10   :  { %359 = vmatpush.bf16.msra.mxu2 %v592_v14  ;;  %v110_v48 = vunpack.c.l.b16 %v29_v45  ;;  %v111_v49 = vunpack.c.h.b16 %v29_v45 }
  0x11   :  { %377 = vmatpush.bf16.msra.mxu3 %v600_v15  ;;  %v116_v50 = vpack.c.b16 %v108_v46, %v108_v46  ;;  %v117_v51 = vpack.c.b16 %v109_v47, %v109_v47 }
  0x12   :  { %324 = vmatpush.bf16.msra.mxu0 %v575_v16  ;;  %v118_v52 = vpack.c.b16 %v110_v48, %v110_v48  ;;  %v119_v53 = vpack.c.b16 %v111_v49, %v111_v49 }
  0x13   :  { %342 = vmatpush.bf16.msra.mxu1 %v583_v17 }
  0x14   :  { %360 = vmatpush.bf16.msra.mxu2 %v591_v18 }
  0x15   :  { %378 = vmatpush.bf16.msra.mxu3 %v599_v19 }
  0x16   :  { %325 = vmatpush.bf16.msra.mxu0 %v574_v20 }
  0x17   :  { %343 = vmatpush.bf16.msra.mxu1 %v582_v21 }
  0x18   :  { %361 = vmatpush.bf16.msra.mxu2 %v590_v22 }
  0x19   :  { %379 = vmatpush.bf16.msra.mxu3 %v598_v23 }
  0x1a   :  { %326 = vmatpush.bf16.msra.mxu0 %v573_v24 }
  0x1b   :  { %344 = vmatpush.bf16.msra.mxu1 %v581_v25 }
  0x1c   :  { %362 = vmatpush.bf16.msra.mxu2 %v589_v26 }
  0x1d   :  { %380 = vmatpush.bf16.msra.mxu3 %v597_v27 }
  0x1e   :  { %327 = vmatpush.bf16.msra.mxu0 %v572_v28 }
  0x1f   :  { %345 = vmatpush.bf16.msra.mxu1 %v580_v29 }
  0x20   :  { %363 = vmatpush.bf16.msra.mxu2 %v588_v30 }
  0x21   :  { %381 = vmatpush.bf16.msra.mxu3 %v596_v31  ;;  %328 = vmatmul.bf16.vlgmr.msra.gmra.mxu0 %v427_v40 }
  0x22   :  { %346 = vmatmul.bf16.vlgmr.msra.gmra.mxu1 %v431_v41 }
  0x23   :  { %364 = vmatmul.bf16.vlgmr.msra.gmra.mxu2 %v435_v42 }
  0x24   :  { %382 = vmatmul.bf16.vlgmr.msra.gmra.mxu3 %v439_v43 }
  0x31   :  { %333 = vmatmul.bf16.gmra.mxu0 %v116_v50 }
  0x32   :  { %351 = vmatmul.bf16.gmra.mxu1 %v117_v51 }
  0x33   :  { %369 = vmatmul.bf16.gmra.mxu2 %v118_v52 }
  0x34   :  { %387 = vmatmul.bf16.gmra.mxu3 %v119_v53 }
  0x9e   :  { %v329_v54 = vpop.f32.mrf.mxu0 }
  0x9f   :  { %v347_v55 = vpop.f32.mrf.mxu1 }
  0xa0   :  { %v348_v56 = vadd.f32 %v347_v55, %v329_v54 }
  0xa6   :  { %v365_v57 = vpop.f32.mrf.mxu2  ;;  %v331_v59 = vpop.f32.mrf.mxu0 }
  0xa7   :  { %v383_v58 = vpop.f32.mrf.mxu3  ;;  %v349_v60 = vpop.f32.mrf.mxu1  ;;  %v366_v61 = vadd.f32 %v365_v57, %v348_v56 }
  0xa8   :  { %v350_v0 = vadd.f32 %v349_v60, %v331_v59 }
  0xa9   :  { %v384_v62 = vadd.f32 %v383_v58, %v366_v61 }
  0xab   :  { %v408_v6 = vadd.f32 %v609_v63, %v384_v62 }
  0xad   :  { %v411_v10 = vmax.f32 %v408_v6, 0.0 }
  0xae   :  { %v367_v1 = vpop.f32.mrf.mxu2  ;;  %v334_v4 = vpop.f32.mrf.mxu0 }
  0xaf   :  { %v385_v2 = vpop.f32.mrf.mxu3  ;;  %v368_v3 = vadd.f32 %v367_v1, %v350_v0  ;;  %v352_v5 = vpop.f32.mrf.mxu1 }
  0xb0   :  { %v353_v9 = vadd.f32 %v352_v5, %v334_v4 }
  0xb1   :  { %v386_v7 = vadd.f32 %v385_v2, %v368_v3 }
  0xb3   :  { %v409_v8 = vadd.f32 %v609_v63, %v386_v7 }
  0xb5   :  { %v412_v11 = vmax.f32 %v409_v8, 0.0 }
  0xb6   :  { %v370_v12 = vpop.f32.mrf.mxu2  ;;  %v336_v16 = vpop.f32.mrf.mxu0 }
  0xb7   :  { %v388_v13 = vpop.f32.mrf.mxu3  ;;  %v607_v14 = vpack.c.bf16 %v412_v11, %v411_v10  ;;  %v371_v15 = vadd.f32 %v370_v12, %v353_v9  ;;  %v354_v17 = vpop.f32.mrf.mxu1 }
  0xb9   :  { %v389_v18 = vadd.f32 %v388_v13, %v371_v15  ;;  %608 = vst [vmem:[%s768_s3] sm:$0xff] %v607_v14  }
  0xbb   :  { %v410_v19 = vadd.f32 %v609_v63, %v389_v18 }
  0xbd   :  { %v413_v20 = vmax.f32 %v410_v19, 0.0 }
  0xbe   :  { %v372_v21 = vpop.f32.mrf.mxu2 }
  0xbf   :  { %v390_v22 = vpop.f32.mrf.mxu3  ;;  %v416_v23 = vpack.c.bf16 %v413_v20, %v413_v20 }
  0xc1   :  { %419 = vst [vmem:[%s768_s3 + $0x8] sm:$0xf] %v416_v23 }

// kernel: qlearner_forward.6
= control target key start
LH: loop header
LB: loop body
LE: loop exit
PB: predicated region body
PF: predicated region fallthrough
CT: control target
= control target key end

     0   :  { %s800_s1 = inlined_call_operand.vmem [shape: bf16[640,128], index: 1, kind: input, shape index: {}]   ;;  %s801_s0 = inlined_call_operand.vmem [shape: bf16[8,640], index: 0, kind: input, shape index: {}]   ;;  %s802_s2 = inlined_call_operand.vmem [shape: f32[1,128], index: 2, kind: input, shape index: {}]   ;;  %s803_s3 = inlined_call_operand.vmem [shape: bf16[8,128], index: 3, kind: output, shape index: {}]  }
   0x1   :  { %v611_v0 = vld [vmem:[%s800_s1 + $0x38] sm:$0xff]  ;;  %v610_v3 = vld [vmem:[%s800_s1 + $0x30] sm:$0xff]  ;;  %v609_v8 = vld [vmem:[%s800_s1 + $0x28] sm:$0xff] }
   0x2   :  { %v627_v1 = vld [vmem:[%s800_s1 + $0xb8] sm:$0xff]  ;;  %361 = vmatpush.bf16.msra.mxu0 %v611_v0  ;;  %v626_v5 = vld [vmem:[%s800_s1 + $0xb0] sm:$0xff]  ;;  %v625_v9 = vld [vmem:[%s800_s1 + $0xa8] sm:$0xff] }
   0x3   :  { %v635_v2 = vld [vmem:[%s800_s1 + $0xf8] sm:$0xff]  ;;  %387 = vmatpush.bf16.msra.mxu2 %v627_v1  ;;  %v634_v6 = vld [vmem:[%s800_s1 + $0xf0] sm:$0xff]  ;;  %v633_v10 = vld [vmem:[%s800_s1 + $0xe8] sm:$0xff] }
   0x4   :  { %v619_v4 = vld [vmem:[%s800_s1 + $0x78] sm:$0xff]  ;;  %400 = vmatpush.bf16.msra.mxu3 %v635_v2  ;;  %v618_v7 = vld [vmem:[%s800_s1 + $0x70] sm:$0xff]  ;;  %v617_v11 = vld [vmem:[%s800_s1 + $0x68] sm:$0xff] }
   0x5   :  { %374 = vmatpush.bf16.msra.mxu1 %v619_v4  ;;  %v608_v12 = vld [vmem:[%s800_s1 + $0x20] sm:$0xff]  ;;  %v607_v16 = vld [vmem:[%s800_s1 + $0x18] sm:$0xff]  ;;  %v606_v20 = vld [vmem:[%s800_s1 + $0x10] sm:$0xff] }
   0x6   :  { %362 = vmatpush.bf16.msra.mxu0 %v610_v3  ;;  %v624_v13 = vld [vmem:[%s800_s1 + $0xa0] sm:$0xff]  ;;  %v623_v17 = vld [vmem:[%s800_s1 + $0x98] sm:$0xff]  ;;  %v622_v21 = vld [vmem:[%s800_s1 + $0x90] sm:$0xff] }
   0x7   :  { %388 = vmatpush.bf16.msra.mxu2 %v626_v5  ;;  %v632_v14 = vld [vmem:[%s800_s1 + $0xe0] sm:$0xff]  ;;  %v631_v18 = vld [vmem:[%s800_s1 + $0xd8] sm:$0xff]  ;;  %v630_v22 = vld [vmem:[%s800_s1 + $0xd0] sm:$0xff] }
   0x8   :  { %401 = vmatpush.bf16.msra.mxu3 %v634_v6  ;;  %v616_v15 = vld [vmem:[%s800_s1 + $0x60] sm:$0xff]  ;;  %v615_v19 = vld [vmem:[%s800_s1 + $0x58] sm:$0xff]  ;;  %v614_v23 = vld [vmem:[%s800_s1 + $0x50] sm:$0xff] }
   0x9   :  { %375 = vmatpush.bf16.msra.mxu1 %v618_v7  ;;  %v605_v24 = vld [vmem:[%s800_s1 + $0x8] sm:$0xff]  ;;  %v20_v25 = vld [vmem:[%s801_s0] sm:$0xff]  ;;  %v643_v33 = vld [vmem:[%s800_s1 + $0x138] sm:$0xff] }
   0xa   :  { %363 = vmatpush.bf16.msra.mxu0 %v609_v8  ;;  %v621_v26 = vld [vmem:[%s800_s1 + $0x88] sm:$0xff]  ;;  %v106_v30 = vunpack.c.l.b16 %v20_v25  ;;  %v604_v31 = vld [vmem:[%s800_s1] sm:$0xff]  ;;  %v107_v38 = vunpack.c.h.b16 %v20_v25  ;;  %v642_v41 = vld [vmem:[%s800_s1 + $0x130] sm:$0xff] }
   0xb   :  { %389 = vmatpush.bf16.msra.mxu2 %v625_v9  ;;  %v629_v27 = vld [vmem:[%s800_s1 + $0xc8] sm:$0xff]  ;;  %v620_v34 = vld [vmem:[%s800_s1 + $0x80] sm:$0xff]  ;;  %v639_v46 = vld [vmem:[%s800_s1 + $0x118] sm:$0xff] }
   0xc   :  { %402 = vmatpush.bf16.msra.mxu3 %v633_v10  ;;  %v21_v28 = vld [vmem:[%s801_s0 + $0x8] sm:$0xff]  ;;  %v628_v36 = vld [vmem:[%s800_s1 + $0xc0] sm:$0xff]  ;;  %v111_v39 = vpack.c.b16 %v106_v30, %v106_v30  ;;  %v112_v43 = vpack.c.b16 %v107_v38, %v107_v38  ;;  %v638_v47 = vld [vmem:[%s800_s1 + $0x110] sm:$0xff] }
   0xd   :  { %376 = vmatpush.bf16.msra.mxu1 %v617_v11  ;;  %v613_v29 = vld [vmem:[%s800_s1 + $0x48] sm:$0xff]  ;;  %v108_v32 = vunpack.c.l.b16 %v21_v28  ;;  %v109_v35 = vunpack.c.h.b16 %v21_v28  ;;  %v612_v37 = vld [vmem:[%s800_s1 + $0x40] sm:$0xff]  ;;  %v22_v49 = vld [vmem:[%s801_s0 + $0x10] sm:$0xf] }
   0xe   :  { %364 = vmatpush.bf16.msra.mxu0 %v608_v12  ;;  %v641_v44 = vld [vmem:[%s800_s1 + $0x128] sm:$0xff]  ;;  %v640_v45 = vld [vmem:[%s800_s1 + $0x120] sm:$0xff]  ;;  %v110_v50 = vunpack.c.l.b16 %v22_v49 }
   0xf   :  { %390 = vmatpush.bf16.msra.mxu2 %v624_v13  ;;  %v113_v40 = vpack.c.b16 %v108_v32, %v108_v32  ;;  %v114_v42 = vpack.c.b16 %v109_v35, %v109_v35  ;;  %v637_v48 = vld [vmem:[%s800_s1 + $0x108] sm:$0xff]  ;;  %v636_v51 = vld [vmem:[%s800_s1 + $0x100] sm:$0xff] }
  0x10   :  { %403 = vmatpush.bf16.msra.mxu3 %v632_v14  ;;  %v115_v52 = vpack.c.b16 %v110_v50, %v110_v50  ;;  %v644_v0 = vld [vmem:[%s802_s2] ss:$0 sm:$0xff] }
  0x11   :  { %377 = vmatpush.bf16.msra.mxu1 %v616_v15 }
  0x12   :  { %365 = vmatpush.bf16.msra.mxu0 %v607_v16 }
  0x13   :  { %391 = vmatpush.bf16.msra.mxu2 %v623_v17 }
  0x14   :  { %404 = vmatpush.bf16.msra.mxu3 %v631_v18 }
  0x15   :  { %378 = vmatpush.bf16.msra.mxu1 %v615_v19 }
  0x16   :  { %366 = vmatpush.bf16.msra.mxu0 %v606_v20 }
  0x17   :  { %392 = vmatpush.bf16.msra.mxu2 %v622_v21 }
  0x18   :  { %405 = vmatpush.bf16.msra.mxu3 %v630_v22 }
  0x19   :  { %379 = vmatpush.bf16.msra.mxu1 %v614_v23 }
  0x1a   :  { %367 = vmatpush.bf16.msra.mxu0 %v605_v24 }
  0x1b   :  { %393 = vmatpush.bf16.msra.mxu2 %v621_v26 }
  0x1c   :  { %406 = vmatpush.bf16.msra.mxu3 %v629_v27 }
  0x1d   :  { %380 = vmatpush.bf16.msra.mxu1 %v613_v29 }
  0x1e   :  { %368 = vmatpush.bf16.msra.mxu0 %v604_v31 }
  0x1f   :  { %394 = vmatpush.bf16.msra.mxu2 %v620_v34 }
  0x20   :  { %407 = vmatpush.bf16.msra.mxu3 %v628_v36 }
  0x21   :  { %381 = vmatpush.bf16.msra.mxu1 %v612_v37  ;;  %369 = vmatmul.bf16.vlgmr.msra.gmra.mxu0 %v111_v39 }
  0x22   :  { %413 = vmatpush.bf16.msrb.mxu0 %v643_v33  ;;  %395 = vmatmul.bf16.vlgmr.msra.gmra.mxu2 %v113_v40 }
  0x23   :  { %408 = vmatmul.bf16.vlgmr.msra.gmra.mxu3 %v114_v42 }
  0x24   :  { %382 = vmatmul.bf16.vlgmr.msra.gmra.mxu1 %v112_v43 }
  0x26   :  { %414 = vmatpush.bf16.msrb.mxu0 %v642_v41 }
  0x2a   :  { %415 = vmatpush.bf16.msrb.mxu0 %v641_v44 }
  0x2e   :  { %416 = vmatpush.bf16.msrb.mxu0 %v640_v45 }
  0x32   :  { %417 = vmatpush.bf16.msrb.mxu0 %v639_v46 }
  0x36   :  { %418 = vmatpush.bf16.msrb.mxu0 %v638_v47 }
  0x3a   :  { %419 = vmatpush.bf16.msrb.mxu0 %v637_v48 }
  0x3e   :  { %420 = vmatpush.bf16.msrb.mxu0 %v636_v51 }
  0x41   :  { %421 = vmatmul.bf16.vlgmr.msrb.gmra.mxu0 %v115_v52 }
  0x9e   :  { %v370_v53 = vpop.f32.mrf.mxu0 }
  0xa1   :  { %v383_v54 = vpop.f32.mrf.mxu1 }
  0xa2   :  { %v384_v61 = vadd.f32 %v383_v54, %v370_v53 }
  0xa5   :  { %v396_v55 = vpop.f32.mrf.mxu2 }
  0xa6   :  { %v372_v56 = vpop.f32.mrf.mxu0  ;;  %v409_v57 = vpop.f32.mrf.mxu3  ;;  %v397_v62 = vadd.f32 %v396_v55, %v384_v61 }
  0xa8   :  { %v410_v63 = vadd.f32 %v409_v57, %v397_v62 }
  0xa9   :  { %v385_v58 = vpop.f32.mrf.mxu1 }
  0xad   :  { %v398_v59 = vpop.f32.mrf.mxu2 }
  0xae   :  { %v411_v60 = vpop.f32.mrf.mxu3 }
  0xbe   :  { %v422_v1 = vpop.f32.mrf.mxu0 }
  0xbf   :  { %v423_v2 = vadd.f32 %v422_v1, %v410_v63 }
  0xc1   :  { %v436_v3 = vadd.f32 %v644_v0, %v423_v2 }
  0xc3   :  { %v437_v4 = vmax.f32 %v436_v3, 0.0 }
  0xc5   :  { %v438_v5 = vpack.c.bf16 %v437_v4, %v437_v4 }
  0xc6   :  { %v424_v6 = vpop.f32.mrf.mxu0 }
  0xc7   :  { %439 = vst [vmem:[%s803_s3] sm:$0xf] %v438_v5 }

// kernel: qlearner_forward.7
= control target key start
LH: loop header
LB: loop body
LE: loop exit
PB: predicated region body
PF: predicated region fallthrough
CT: control target
= control target key end

     0   :  { %vm128_vm0 = vcmask 523264   ;;  %s988_s1 = inlined_call_operand.vmem [shape: bf16[64,512], index: 1, kind: input, shape index: {}]   ;;  %s989_s3 = inlined_call_operand.vmem [shape: bf16[512,128], index: 3, kind: input, shape index: {}]   ;;  %s990_s0 = inlined_call_operand.vmem [shape: bf16[8,64], index: 0, kind: input, shape index: {}]   ;;  %s991_s4 = inlined_call_operand.vmem [shape: f32[1,128], index: 4, kind: input, shape index: {}]   ;;  %s992_s2 = inlined_call_operand.vmem [shape: f32[1,512], index: 2, kind: input, shape index: {}]   ;;  %s993_s5 = inlined_call_operand.vmem [shape: f32[8,128], index: 5, kind: output, shape index: {}]  }
   0x1   :  { %v567_v0 = vld [vmem:[%s988_s1 + $0x68] sm:$0xf]  ;;  %v720_v1 = vld [vmem:[%s988_s1 + $0x74] sm:$0xf0]  ;;  %v718_v2 = vld [vmem:[%s988_s1 + $0x6c] sm:$0xf] }
   0x2   :  { %v568_v3 = vor.u32 %v720_v1, %v567_v0  ;;  %v569_v4 = vld [vmem:[%s988_s1 + $0x78] sm:$0xf0]  ;;  %v559_v5 = vld [vmem:[%s988_s1 + $0x60] sm:$0xf]  ;;  %v719_v6 = vld [vmem:[%s988_s1 + $0x6c] sm:$0xf0] }
   0x3   :  { %v572_v7 = vor.u32 %v718_v2, %v569_v4  ;;  %v560_v8 = vor.u32 %v719_v6, %v559_v5  ;;  %v717_v9 = vld [vmem:[%s988_s1 + $0x64] sm:$0xf]  ;;  %v561_v10 = vld [vmem:[%s988_s1 + $0x70] sm:$0xf0]  ;;  %v551_v11 = vld [vmem:[%s988_s1 + $0x48] sm:$0xf] }
   0x4   :  { %162 = vmatpush.bf16.msra.mxu2 %v568_v3  ;;  %v564_v12 = vor.u32 %v717_v9, %v561_v10  ;;  %v716_v13 = vld [vmem:[%s988_s1 + $0x54] sm:$0xf0]  ;;  %v714_v14 = vld [vmem:[%s988_s1 + $0x4c] sm:$0xf]  ;;  %v553_v15 = vld [vmem:[%s988_s1 + $0x58] sm:$0xf0] }
   0x5   :  { %175 = vmatpush.bf16.msra.mxu3 %v572_v7  ;;  %136 = vmatpush.bf16.msra.mxu0 %v560_v8  ;;  %v552_v16 = vor.u32 %v716_v13, %v551_v11  ;;  %v556_v17 = vor.u32 %v714_v14, %v553_v15  ;;  %v543_v18 = vld [vmem:[%s988_s1 + $0x40] sm:$0xf]  ;;  %v715_v19 = vld [vmem:[%s988_s1 + $0x4c] sm:$0xf0]  ;;  %v713_v20 = vld [vmem:[%s988_s1 + $0x44] sm:$0xf] }
   0x6   :  { %149 = vmatpush.bf16.msra.mxu1 %v564_v12  ;;  %v544_v21 = vor.u32 %v715_v19, %v543_v18  ;;  %v545_v22 = vld [vmem:[%s988_s1 + $0x50] sm:$0xf0]  ;;  %v535_v23 = vld [vmem:[%s988_s1 + $0x28] sm:$0xf]  ;;  %v712_v24 = vld [vmem:[%s988_s1 + $0x34] sm:$0xf0] }
   0x7   :  { %v548_v25 = vor.u32 %v713_v20, %v545_v22  ;;  %v710_v26 = vld [vmem:[%s988_s1 + $0x2c] sm:$0xf]  ;;  %v537_v27 = vld [vmem:[%s988_s1 + $0x38] sm:$0xf0]  ;;  %v527_v28 = vld [vmem:[%s988_s1 + $0x20] sm:$0xf]  ;;  %v536_v29 = vor.u32 %v712_v24, %v535_v23 }
   0x8   :  { %163 = vmatpush.bf16.msra.mxu2 %v552_v16  ;;  %v711_v30 = vld [vmem:[%s988_s1 + $0x2c] sm:$0xf0]  ;;  %v709_v31 = vld [vmem:[%s988_s1 + $0x24] sm:$0xf]  ;;  %v529_v32 = vld [vmem:[%s988_s1 + $0x30] sm:$0xf0]  ;;  %v540_v33 = vor.u32 %v710_v26, %v537_v27 }
   0x9   :  { %176 = vmatpush.bf16.msra.mxu3 %v556_v17  ;;  %137 = vmatpush.bf16.msra.mxu0 %v544_v21  ;;  %v528_v34 = vor.u32 %v711_v30, %v527_v28  ;;  %v519_v35 = vld [vmem:[%s988_s1 + $0x8] sm:$0xf]  ;;  %v708_v36 = vld [vmem:[%s988_s1 + $0x14] sm:$0xf0]  ;;  %v706_v37 = vld [vmem:[%s988_s1 + $0xc] sm:$0xf]  ;;  %v532_v38 = vor.u32 %v709_v31, %v529_v32 }
   0xa   :  { %150 = vmatpush.bf16.msra.mxu1 %v548_v25  ;;  %v521_v39 = vld [vmem:[%s988_s1 + $0x18] sm:$0xf0]  ;;  %v511_v40 = vld [vmem:[%s988_s1] sm:$0xf]  ;;  %v707_v41 = vld [vmem:[%s988_s1 + $0xc] sm:$0xf0]  ;;  %v520_v44 = vor.u32 %v708_v36, %v519_v35 }
   0xb   :  { %v705_v42 = vld [vmem:[%s988_s1 + $0x4] sm:$0xf]  ;;  %v513_v43 = vld [vmem:[%s988_s1 + $0x10] sm:$0xf0]  ;;  %v524_v45 = vor.u32 %v706_v37, %v521_v39  ;;  %v512_v46 = vor.u32 %v707_v41, %v511_v40  ;;  %v728_v48 = vld [vmem:[%s989_s3 + $0x38] sm:$0xff] }
   0xc   :  { %164 = vmatpush.bf16.msra.mxu2 %v536_v29  ;;  %v516_v47 = vor.u32 %v705_v42, %v513_v43  ;;  %v736_v49 = vld [vmem:[%s989_s3 + $0x78] sm:$0xff]  ;;  %v21_v50 = vld [vmem:[%s990_s0] sm:$0xf]  ;;  %v727_v53 = vld [vmem:[%s989_s3 + $0x30] sm:$0xff] }
   0xd   :  { %177 = vmatpush.bf16.msra.mxu3 %v540_v33  ;;  %138 = vmatpush.bf16.msra.mxu0 %v528_v34  ;;  %v744_v51 = vld [vmem:[%s989_s3 + $0xb8] sm:$0xff]  ;;  %v735_v54 = vld [vmem:[%s989_s3 + $0x70] sm:$0xff]  ;;  %v726_v57 = vld [vmem:[%s989_s3 + $0x28] sm:$0xff] }
   0xe   :  { %151 = vmatpush.bf16.msra.mxu1 %v532_v38  ;;  %v752_v52 = vld [vmem:[%s989_s3 + $0xf8] sm:$0xff]  ;;  %v743_v55 = vld [vmem:[%s989_s3 + $0xb0] sm:$0xff]  ;;  %v734_v58 = vld [vmem:[%s989_s3 + $0x68] sm:$0xff] }
   0xf   :  { %v751_v56 = vld [vmem:[%s989_s3 + $0xf0] sm:$0xff]  ;;  %v742_v59 = vld [vmem:[%s989_s3 + $0xa8] sm:$0xff]  ;;  %v725_v61 = vld [vmem:[%s989_s3 + $0x20] sm:$0xff] }
  0x10   :  { %165 = vmatpush.bf16.msra.mxu2 %v520_v44  ;;  %v750_v60 = vld [vmem:[%s989_s3 + $0xe8] sm:$0xff]  ;;  %v733_v62 = vld [vmem:[%s989_s3 + $0x60] sm:$0xff]  ;;  %v724_v1 = vld [vmem:[%s989_s3 + $0x18] sm:$0xff] }
  0x11   :  { %178 = vmatpush.bf16.msra.mxu3 %v524_v45  ;;  %139 = vmatpush.bf16.msra.mxu0 %v512_v46  ;;  %v741_v63 = vld [vmem:[%s989_s3 + $0xa0] sm:$0xff]  ;;  %v732_v2 = vld [vmem:[%s989_s3 + $0x58] sm:$0xff]  ;;  %v723_v5 = vld [vmem:[%s989_s3 + $0x10] sm:$0xff] }
  0x12   :  { %152 = vmatpush.bf16.msra.mxu1 %v516_v47  ;;  %v749_v0 = vld [vmem:[%s989_s3 + $0xe0] sm:$0xff]  ;;  %v740_v3 = vld [vmem:[%s989_s3 + $0x98] sm:$0xff]  ;;  %v731_v6 = vld [vmem:[%s989_s3 + $0x50] sm:$0xff] }
  0x13   :  { %575 = vmatmul.msk.bf16.vlgmr.msra.gmra.mxu2 %vm128_vm0, %v21_v50  ;;  %v748_v4 = vld [vmem:[%s989_s3 + $0xd8] sm:$0xff]  ;;  %v739_v7 = vld [vmem:[%s989_s3 + $0x90] sm:$0xff]  ;;  %v722_v9 = vld [vmem:[%s989_s3 + $0x8] sm:$0xff] }
  0x14   :  { %576 = vmatmul.msk.bf16.vlgmr.msra.gmra.mxu3 %vm128_vm0, %v21_v50  ;;  %573 = vmatmul.msk.bf16.vlgmr.msra.gmra.mxu0 %vm128_vm0, %v21_v50  ;;  %v747_v8 = vld [vmem:[%s989_s3 + $0xd0] sm:$0xff]  ;;  %v730_v10 = vld [vmem:[%s989_s3 + $0x48] sm:$0xff]  ;;  %v721_v13 = vld [vmem:[%s989_s3] sm:$0xff] }
  0x15   :  { %452 = vmatpush.bf16.msrb.mxu0 %v728_v48  ;;  %574 = vmatmul.msk.bf16.vlgmr.msra.gmra.mxu1 %vm128_vm0, %v21_v50  ;;  %v738_v11 = vld [vmem:[%s989_s3 + $0x88] sm:$0xff]  ;;  %v729_v14 = vld [vmem:[%s989_s3 + $0x40] sm:$0xff] }
  0x16   :  { %465 = vmatpush.bf16.msrb.mxu1 %v736_v49  ;;  %478 = vmatpush.bf16.msrb.mxu2 %v744_v51  ;;  %v746_v12 = vld [vmem:[%s989_s3 + $0xc8] sm:$0xff]  ;;  %v737_v15 = vld [vmem:[%s989_s3 + $0x80] sm:$0xff] }
  0x17   :  { %491 = vmatpush.bf16.msrb.mxu3 %v752_v52  ;;  %v745_v16 = vld [vmem:[%s989_s3 + $0xc0] sm:$0xff] }
  0x18   :  { %v38_v17 = vld [vmem:[%s992_s2] sm:$0xf] }
  0x19   :  { %453 = vmatpush.bf16.msrb.mxu0 %v727_v53  ;;  %v40_v18 = vperm.slane %v38_v17, 0  ;;  %v41_v19 = vperm.slane %v38_v17, 1  ;;  %v42_v24 = vperm.slane %v38_v17, 2  ;;  %v43_v26 = vperm.slane %v38_v17, 3  ;;  %v753_v42 = vld [vmem:[%s991_s4] ss:$0 sm:$0xff] }
  0x1a   :  { %466 = vmatpush.bf16.msrb.mxu1 %v735_v54  ;;  %479 = vmatpush.bf16.msrb.mxu2 %v743_v55 }
  0x1b   :  { %492 = vmatpush.bf16.msrb.mxu3 %v751_v56 }
  0x1d   :  { %454 = vmatpush.bf16.msrb.mxu0 %v726_v57 }
  0x1e   :  { %467 = vmatpush.bf16.msrb.mxu1 %v734_v58  ;;  %480 = vmatpush.bf16.msrb.mxu2 %v742_v59 }
  0x1f   :  { %493 = vmatpush.bf16.msrb.mxu3 %v750_v60 }
  0x21   :  { %455 = vmatpush.bf16.msrb.mxu0 %v725_v61 }
  0x22   :  { %468 = vmatpush.bf16.msrb.mxu1 %v733_v62  ;;  %481 = vmatpush.bf16.msrb.mxu2 %v741_v63 }
  0x23   :  { %494 = vmatpush.bf16.msrb.mxu3 %v749_v0 }
  0x25   :  { %456 = vmatpush.bf16.msrb.mxu0 %v724_v1 }
  0x26   :  { %469 = vmatpush.bf16.msrb.mxu1 %v732_v2  ;;  %482 = vmatpush.bf16.msrb.mxu2 %v740_v3 }
  0x27   :  { %495 = vmatpush.bf16.msrb.mxu3 %v748_v4 }
  0x29   :  { %457 = vmatpush.bf16.msrb.mxu0 %v723_v5 }
  0x2a   :  { %470 = vmatpush.bf16.msrb.mxu1 %v731_v6  ;;  %483 = vmatpush.bf16.msrb.mxu2 %v739_v7 }
  0x2b   :  { %496 = vmatpush.bf16.msrb.mxu3 %v747_v8 }
  0x2d   :  { %458 = vmatpush.bf16.msrb.mxu0 %v722_v9 }
  0x2e   :  { %471 = vmatpush.bf16.msrb.mxu1 %v730_v10  ;;  %484 = vmatpush.bf16.msrb.mxu2 %v738_v11 }
  0x2f   :  { %497 = vmatpush.bf16.msrb.mxu3 %v746_v12 }
  0x31   :  { %459 = vmatpush.bf16.msrb.mxu0 %v721_v13 }
  0x32   :  { %472 = vmatpush.bf16.msrb.mxu1 %v729_v14  ;;  %485 = vmatpush.bf16.msrb.mxu2 %v737_v15 }
  0x33   :  { %498 = vmatpush.bf16.msrb.mxu3 %v745_v16 }
  0x91   :  { %v141_v20 = vpop.f32.mrf.mxu0 }
  0x92   :  { %v142_v21 = vadd.f32 %v141_v20, %v40_v18  ;;  %v154_v22 = vpop.f32.mrf.mxu1 }
  0x93   :  { %v155_v23 = vadd.f32 %v154_v22, %v41_v19 }
  0x94   :  { %v184_v25 = vmax.f32 %v142_v21, 0.0 }
  0x95   :  { %v185_v27 = vmax.f32 %v155_v23, 0.0 }
  0x96   :  { %v188_v28 = vpack.c.bf16 %v184_v25, %v184_v25  ;;  %v167_v29 = vpop.f32.mrf.mxu2 }
  0x97   :  { %v189_v30 = vpack.c.bf16 %v185_v27, %v185_v27  ;;  %v168_v31 = vadd.f32 %v167_v29, %v42_v24  ;;  %v180_v32 = vpop.f32.mrf.mxu3 }
  0x98   :  { %v181_v33 = vadd.f32 %v180_v32, %v43_v26  ;;  %460 = vmatmul.bf16.vlgmr.msrb.gmra.mxu0 %v188_v28 }
  0x99   :  { %v186_v34 = vmax.f32 %v168_v31, 0.0  ;;  %v143_v35 = vpop.f32.mrf.mxu0  ;;  %473 = vmatmul.bf16.vlgmr.msrb.gmra.mxu1 %v189_v30 }
  0x9a   :  { %v187_v36 = vmax.f32 %v181_v33, 0.0  ;;  %v156_v37 = vpop.f32.mrf.mxu1 }
  0x9b   :  { %v190_v38 = vpack.c.bf16 %v186_v34, %v186_v34 }
  0x9c   :  { %v191_v39 = vpack.c.bf16 %v187_v36, %v187_v36 }
  0x9d   :  { %486 = vmatmul.bf16.vlgmr.msrb.gmra.mxu2 %v190_v38 }
  0x9e   :  { %499 = vmatmul.bf16.vlgmr.msrb.gmra.mxu3 %v191_v39  ;;  %v169_v40 = vpop.f32.mrf.mxu2 }
  0x9f   :  { %v182_v41 = vpop.f32.mrf.mxu3 }
 0x115   :  { %v461_v43 = vpop.f32.mrf.mxu0 }
 0x116   :  { %v474_v44 = vpop.f32.mrf.mxu1  ;;  %v462_v45 = vadd.f32 %v753_v42, %v461_v43 }
 0x118   :  { %v475_v46 = vadd.f32 %v474_v44, %v462_v45 }
 0x11d   :  { %v463_v47 = vpop.f32.mrf.mxu0 }
 0x11e   :  { %v476_v48 = vpop.f32.mrf.mxu1 }
 0x120   :  { %v487_v49 = vpop.f32.mrf.mxu2 }
 0x121   :  { %v488_v50 = vadd.f32 %v487_v49, %v475_v46  ;;  %v500_v51 = vpop.f32.mrf.mxu3 }
 0x123   :  { %v501_v52 = vadd.f32 %v500_v51, %v488_v50 }
 0x125   :  { %504 = vst [vmem:[%s993_s5] sm:$0xff] %v501_v52 }
 0x128   :  { %v489_v53 = vpop.f32.mrf.mxu2 }
 0x129   :  { %v502_v54 = vpop.f32.mrf.mxu3 }

</bundles_post_ra>
